<compile_context>
chip_gen: v7x
topology: tpu7x:2x2x1
jax: 0.10.0
libtpu: 0.0.40
codegen_flags: <defaults>
</compile_context>

<pallas_src>
import functools

import jax
import jax.numpy as jnp
from jax import lax
from jax.experimental import pallas as pl
from jax.experimental.pallas import tpu as pltpu


_VMEM_LIMIT = 32 * 1024 * 1024  # scoped-VMEM budget: safe on v5e/v6e (128 MiB) and v7x (64 MiB)


# ---------------------------------------------------------------------------
# tiling helpers
# ---------------------------------------------------------------------------

def _row_tile(m, target=256):
    """Largest multiple-of-8 divisor of m that is <= target (preferring >=2 grid steps
    when m allows) so row blocks satisfy the (8,128) constraint; falls back to full m."""
    cap = min(target, m)
    if m >= 16:
        cap = min(cap, m // 2)      # give the grid >=2 steps for megacore when possible
    best = 0
    t = 8
    while t <= cap:
        if m % t == 0:
            best = t
        t += 8
    return best if best > 0 else m


def _h_tile(h, w, c, budget_bytes=4 * 1024 * 1024):
    """Largest divisor TH of h whose dwconv working set (halo slab + accumulator) fits
    the VMEM budget; keeps the depthwise kernel portable to v7x's smaller VMEM."""
    best = 1
    for th in range(1, h + 1):
        if h % th:
            continue
        approx = ((th + 6) * (w + 6) + 4 * th * w) * c * 4
        if approx <= budget_bytes:
            best = th
    return best


def _compiler_params(semantics):
    return pltpu.CompilerParams(dimension_semantics=semantics,
                                vmem_limit_bytes=_VMEM_LIMIT)


# ---------------------------------------------------------------------------
# in-kernel math helpers
# ---------------------------------------------------------------------------

def _erf(x):
    # Abramowitz & Stegun 7.1.26 rational approximation (max abs err ~1.5e-7 in exact
    # arithmetic); the reciprocal is routed to the EUP (approx vrcp), exp also on EUP.
    a1, a2, a3, a4, a5 = 0.254829592, -0.284496736, 1.421413741, -1.453152027, 1.061405429
    p = 0.3275911
    s = jnp.sign(x)
    ax = jnp.abs(x)
    t = pl.reciprocal(1.0 + p * ax, approx=True)
    poly = ((((a5 * t + a4) * t + a3) * t + a2) * t + a1) * t
    return s * (1.0 - poly * jnp.exp(-ax * ax))


def _gelu(x):
    # exact (erf-based) GELU, matching nn.GELU() default
    return 0.5 * x * (1.0 + _erf(x * 0.7071067811865476))


# ---------------------------------------------------------------------------
# Pallas kernels
# ---------------------------------------------------------------------------

def _matmul_bias_kernel(x_ref, w_ref, b_ref, o_ref):
    # x: (TM, K) row tile, w: (K, N) resident, b: (1, N).  bf16 MXU dot, f32 accumulate.
    acc = jnp.dot(x_ref[...].astype(jnp.bfloat16), w_ref[...].astype(jnp.bfloat16),
                  preferred_element_type=jnp.float32)
    o_ref[...] = (acc + b_ref[...]).astype(o_ref.dtype)


def _matmul_bias_ln_kernel(x_ref, w_ref, b_ref, lnw_ref, lnb_ref, o_ref, *, eps):
    # Fused stem: 4x4/s4 conv (as matmul over patch rows) + channels_first LayerNorm,
    # which over NHWC rows is a last-dim LN on the conv output channels.
    acc = jnp.dot(x_ref[...].astype(jnp.bfloat16), w_ref[...].astype(jnp.bfloat16),
                  preferred_element_type=jnp.float32) + b_ref[...]
    mean = jnp.mean(acc, axis=-1, keepdims=True)
    var = jnp.mean((acc - mean) ** 2, axis=-1, keepdims=True)
    xn = (acc - mean) * lax.rsqrt(var + eps)
    o_ref[...] = (xn * lnw_ref[...] + lnb_ref[...]).astype(o_ref.dtype)


def _layernorm_kernel(x_ref, w_ref, b_ref, o_ref, *, eps):
    # LayerNorm over the last (channel) dim of a (TM, C) row tile.
    x = x_ref[...].astype(jnp.float32)
    mean = jnp.mean(x, axis=-1, keepdims=True)
    var = jnp.mean((x - mean) ** 2, axis=-1, keepdims=True)
    xn = (x - mean) * lax.rsqrt(var + eps)
    o_ref[...] = (xn * w_ref[...] + b_ref[...]).astype(o_ref.dtype)


def _dwconv7x7_kernel(xp_hbm, w_ref, b_ref, o_ref, slab_ref):
    # Depthwise 7x7, pad 3.  xp_hbm: (N, H+6, W+6, C) zero-padded input left in HBM
    # (memory_space=pl.ANY).  Each grid step (n, hi) DMAs its (1, TH+6, W+6, C) halo slab
    # into VMEM scratch, so VMEM use is bounded regardless of image size.
    _, th, W, C = o_ref.shape
    n = pl.program_id(0)
    hi = pl.program_id(1)
    h0 = pl.multiple_of(hi * th, th)
    pltpu.sync_copy(xp_hbm.at[pl.ds(n, 1), pl.ds(h0, th + 6), :, :], slab_ref)
    xp = slab_ref[...]
    w = w_ref[...]                                   # (49, C) resident taps
    acc = jnp.zeros((1, th, W, C), jnp.float32)
    for kh in range(7):
        for kw in range(7):
            acc = acc + xp[:, kh:kh + th, kw:kw + W, :] * w[kh * 7 + kw]
    o_ref[...] = (acc + b_ref[...]).astype(o_ref.dtype)


def _block_mlp_kernel(x_ref, res_ref, lnw_ref, lnb_ref, w1_ref, b1_ref,
                      w2_ref, b2_ref, gamma_ref, o_ref, *, eps):
    # Row tile (TM, C): LN -> pwconv1 -> GELU -> pwconv2 -> layer-scale -> residual
    # (drop_path is Identity for rate 0).  Weights are VMEM-resident across the grid.
    x = x_ref[...].astype(jnp.float32)
    mean = jnp.mean(x, axis=-1, keepdims=True)
    var = jnp.mean((x - mean) ** 2, axis=-1, keepdims=True)
    xn = (x - mean) * lax.rsqrt(var + eps)
    xn = xn * lnw_ref[...] + lnb_ref[...]
    h = jnp.dot(xn.astype(jnp.bfloat16), w1_ref[...].astype(jnp.bfloat16),
                preferred_element_type=jnp.float32) + b1_ref[...]
    h = _gelu(h)
    y = jnp.dot(h.astype(jnp.bfloat16), w2_ref[...].astype(jnp.bfloat16),
                preferred_element_type=jnp.float32) + b2_ref[...]
    o_ref[...] = (res_ref[...] + gamma_ref[...] * y).astype(o_ref.dtype)


# ---------------------------------------------------------------------------
# wrappers around pallas_call
# ---------------------------------------------------------------------------

def matmul_bias(x, w, b, *, ln_w=None, ln_b=None, eps=1e-6):
    """Row-tiled (TM,K)x(K,N)+bias matmul; optionally fused with a last-dim LayerNorm."""
    M, K = x.shape
    _, N = w.shape
    tm = _row_tile(M)
    row_spec = pl.BlockSpec((tm, K), lambda i: (i, 0))
    out_spec = pl.BlockSpec((tm, N), lambda i: (i, 0))
    w_spec = pl.BlockSpec((K, N), lambda i: (0, 0))

    def vec(n):
        return pl.BlockSpec((1, n), lambda i: (0, 0))

    if ln_w is None:
        kernel = _matmul_bias_kernel
        in_specs = [row_spec, w_spec, vec(N)]
        args = (x, w, b.reshape(1, N))
    else:
        kernel = functools.partial(_matmul_bias_ln_kernel, eps=eps)
        in_specs = [row_spec, w_spec, vec(N), vec(N), vec(N)]
        args = (x, w, b.reshape(1, N), ln_w.reshape(1, N), ln_b.reshape(1, N))

    return pl.pallas_call(
        kernel,
        out_shape=jax.ShapeDtypeStruct((M, N), jnp.float32),
        grid=(M // tm,),
        in_specs=in_specs,
        out_specs=out_spec,
        compiler_params=_compiler_params(("parallel",)),
    )(*args)


def layernorm_lastdim(x2d, w, b, eps=1e-6):
    M, C = x2d.shape
    tm = _row_tile(M)
    return pl.pallas_call(
        functools.partial(_layernorm_kernel, eps=eps),
        out_shape=jax.ShapeDtypeStruct((M, C), jnp.float32),
        grid=(M // tm,),
        in_specs=[pl.BlockSpec((tm, C), lambda i: (i, 0)),
                  pl.BlockSpec((1, C), lambda i: (0, 0)),
                  pl.BlockSpec((1, C), lambda i: (0, 0))],
        out_specs=pl.BlockSpec((tm, C), lambda i: (i, 0)),
        compiler_params=_compiler_params(("parallel",)),
    )(x2d, w.reshape(1, C), b.reshape(1, C))


def convnext_block(x_nhwc, p, eps=1e-6):
    N, H, W, C = x_nhwc.shape

    # --- depthwise 7x7 conv, pad=3, tiled over (batch, H) ---
    # TODO(synk): replace the jnp.pad glue with in-kernel halo handling (zero-init slab +
    # interior-only DMA) to avoid materializing a padded copy of the feature map in HBM.
    xp = jnp.pad(x_nhwc, ((0, 0), (3, 3), (3, 3), (0, 0)))
    th = _h_tile(H, W, C)
    dw = pl.pallas_call(
        _dwconv7x7_kernel,
        out_shape=jax.ShapeDtypeStruct((N, H, W, C), jnp.float32),
        grid=(N, H // th),
        in_specs=[pl.BlockSpec(memory_space=pl.ANY),              # padded input stays in HBM
                  pl.BlockSpec((49, C), lambda n, h: (0, 0)),
                  pl.BlockSpec((1, C), lambda n, h: (0, 0))],
        out_specs=pl.BlockSpec((1, th, W, C), lambda n, h: (n, h, 0, 0)),
        scratch_shapes=[pltpu.VMEM((1, th + 6, W + 6, C), jnp.float32)],
        compiler_params=_compiler_params(("parallel", "arbitrary")),
    )(xp, p['dw_w'].reshape(49, C), p['dw_b'].reshape(1, C))

    # --- fused LN + MLP + layer-scale + residual on (M, C) rows, row-tiled ---
    # TODO(synk): fuse the dwconv output directly into this kernel (skip the HBM round-trip)
    # once an in-kernel (TH, W, C)->(TH*W, C) reshape is guaranteed for W % 8 != 0 tiles.
    M = N * H * W
    rows = dw.reshape(M, C)
    res = x_nhwc.reshape(M, C)
    tm = _row_tile(M)
    row_spec = pl.BlockSpec((tm, C), lambda i: (i, 0))
    vec_c = pl.BlockSpec((1, C), lambda i: (0, 0))
    out = pl.pallas_call(
        functools.partial(_block_mlp_kernel, eps=eps),
        out_shape=jax.ShapeDtypeStruct((M, C), jnp.float32),
        grid=(M // tm,),
        in_specs=[row_spec, row_spec, vec_c, vec_c,
                  pl.BlockSpec((C, 4 * C), lambda i: (0, 0)),
                  pl.BlockSpec((1, 4 * C), lambda i: (0, 0)),
                  pl.BlockSpec((4 * C, C), lambda i: (0, 0)),
                  vec_c, vec_c],
        out_specs=row_spec,
        compiler_params=_compiler_params(("parallel",)),
    )(rows, res, p['ln_w'].reshape(1, C), p['ln_b'].reshape(1, C),
      p['w1'], p['b1'].reshape(1, 4 * C), p['w2'], p['b2'].reshape(1, C),
      p['gamma'].reshape(1, C))
    return out.reshape(N, H, W, C)


# ---------------------------------------------------------------------------
# model: parameters + forward
# ---------------------------------------------------------------------------

def init_params(key, in_chans=3, depths=(1, 1, 1, 1), dims=(8, 16, 32, 64),
                layer_scale_init_value=1e-6):
    def trunc_normal(k, shape, std=0.02):
        return (std * jax.random.truncated_normal(k, -2.0, 2.0, shape)).astype(jnp.float32)

    keys = iter(jax.random.split(key, 64))
    params = {'downsample': [], 'stages': []}

    # stem: Conv2d(in_chans, dims[0], k=4, s=4) + LayerNorm(channels_first)
    params['downsample'].append({
        'conv_w': trunc_normal(next(keys), (4 * 4 * in_chans, dims[0])),  # (kh*kw*cin, cout)
        'conv_b': jnp.zeros((dims[0],), jnp.float32),
        'ln_w': jnp.ones((dims[0],), jnp.float32),
        'ln_b': jnp.zeros((dims[0],), jnp.float32),
    })
    # downsample i: LayerNorm(channels_first) + Conv2d(dims[i-1], dims[i], k=2, s=2)
    for i in range(1, 4):
        params['downsample'].append({
            'ln_w': jnp.ones((dims[i - 1],), jnp.float32),
            'ln_b': jnp.zeros((dims[i - 1],), jnp.float32),
            'conv_w': trunc_normal(next(keys), (2 * 2 * dims[i - 1], dims[i])),
            'conv_b': jnp.zeros((dims[i],), jnp.float32),
        })
    # stages of ConvNeXt Blocks
    for i in range(4):
        d = dims[i]
        stage = []
        for _ in range(depths[i]):
            stage.append({
                # NOTE: depthwise weight stored as (7, 7, C); PyTorch's (C,1,7,7) would
                # need a transpose before loading here.
                'dw_w': trunc_normal(next(keys), (7, 7, d)),
                'dw_b': jnp.zeros((d,), jnp.float32),
                'ln_w': jnp.ones((d,), jnp.float32),
                'ln_b': jnp.zeros((d,), jnp.float32),
                'w1': trunc_normal(next(keys), (d, 4 * d)),
                'b1': jnp.zeros((4 * d,), jnp.float32),
                'w2': trunc_normal(next(keys), (4 * d, d)),
                'b2': jnp.zeros((d,), jnp.float32),
                'gamma': jnp.full((d,), layer_scale_init_value, jnp.float32),
            })
        params['stages'].append(stage)
    return params


def patchify(x_nhwc, k):
    # non-overlapping kxk patches (stride == kernel) -> rows of (kh, kw, C)
    # TODO(synk): fold this strided-patch gather into the matmul kernel's index_map to
    # avoid the XLA transpose copy of the feature map.
    N, H, W, C = x_nhwc.shape
    Ho, Wo = H // k, W // k
    x = x_nhwc.reshape(N, Ho, k, Wo, k, C).transpose(0, 1, 3, 2, 4, 5)
    return x.reshape(N * Ho * Wo, k * k * C), (N, Ho, Wo)


def convnext_forward(x_nchw, params, *, in_chans=3):
    # matches PyTorch: if in_chans == 3, x = x.repeat(1, 3, 1, 1)
    if in_chans == 3:
        x_nchw = jnp.tile(x_nchw, (1, 3, 1, 1))
    x = jnp.transpose(x_nchw, (0, 2, 3, 1))  # NCHW -> NHWC
    features = []
    for i in range(4):
        ds = params['downsample'][i]
        if i == 0:
            rows, (N, Ho, Wo) = patchify(x, 4)
            # fused stem conv + channels_first LayerNorm (single kernel)
            rows = matmul_bias(rows, ds['conv_w'], ds['conv_b'],
                               ln_w=ds['ln_w'], ln_b=ds['ln_b'])
        else:
            N, H, W, C = x.shape
            rows = layernorm_lastdim(x.reshape(N * H * W, C), ds['ln_w'], ds['ln_b'])
            rows, (N, Ho, Wo) = patchify(rows.reshape(N, H, W, C), 2)
            rows = matmul_bias(rows, ds['conv_w'], ds['conv_b'])
        x = rows.reshape(N, Ho, Wo, -1)
        for blk in params['stages'][i]:
            x = convnext_block(x, blk)
        features.append(jnp.transpose(x, (0, 3, 1, 2)))  # NHWC -> NCHW
    return features


if __name__ == "__main__":
    key = jax.random.PRNGKey(0)
    pkey, xkey = jax.random.split(key)

    in_chans = 3
    depths = (1, 1, 1, 1)
    dims = (8, 16, 32, 64)

    params = init_params(pkey, in_chans=in_chans, depths=depths, dims=dims)

    # grayscale NCHW input; the forward repeats it to 3 channels (in_chans == 3 path).
    # 32x32 spatial keeps the deepest stage at 1x1 after the /32 total stride.
    x = jax.random.normal(xkey, (2, 1, 32, 32), dtype=jnp.float32)

    feats = convnext_forward(x, params, in_chans=in_chans)
    feats = jax.block_until_ready(feats)
    print("KERNEL_OK")
</pallas_src>

<mosaic_0001>
module attributes {stable_mosaic.version = 11 : i64} {
  func.func @_matmul_bias_ln_kernel(%arg0: i32, %arg1: memref<64x48xf32, #tpu.memory_space<vmem>>, %arg2: memref<48x8xf32, #tpu.memory_space<vmem>>, %arg3: memref<1x8xf32, #tpu.memory_space<vmem>>, %arg4: memref<1x8xf32, #tpu.memory_space<vmem>>, %arg5: memref<1x8xf32, #tpu.memory_space<vmem>>, %arg6: memref<64x8xf32, #tpu.memory_space<vmem>>) attributes {dimension_semantics = [#tpu.dimension_semantics<parallel>], iteration_bounds = array<i64: 2>, scalar_prefetch = 0 : i64, scratch_operands = 0 : i64, tpu.core_type = #tpu.core_type<tc>, window_params = [{transform_indices = @transform_0, window_bounds = array<i64: 64, 48>}, {pipeline_mode = #tpu.pipeline_mode<synchronous>, transform_indices = @transform_1, window_bounds = array<i64: 48, 8>}, {pipeline_mode = #tpu.pipeline_mode<synchronous>, transform_indices = @transform_2, window_bounds = array<i64: 1, 8>}, {pipeline_mode = #tpu.pipeline_mode<synchronous>, transform_indices = @transform_3, window_bounds = array<i64: 1, 8>}, {pipeline_mode = #tpu.pipeline_mode<synchronous>, transform_indices = @transform_4, window_bounds = array<i64: 1, 8>}, {transform_indices = @transform_5, window_bounds = array<i64: 64, 8>}]} {
    %c0 = arith.constant 0 : index
    %c0_0 = arith.constant 0 : index
    %0 = vector.load %arg1[%c0, %c0_0] : memref<64x48xf32, #tpu.memory_space<vmem>>, vector<64x48xf32>
    %1 = arith.truncf %0 : vector<64x48xf32> to vector<64x48xbf16>
    %c0_1 = arith.constant 0 : index
    %c0_2 = arith.constant 0 : index
    %2 = vector.load %arg2[%c0_1, %c0_2] : memref<48x8xf32, #tpu.memory_space<vmem>>, vector<48x8xf32>
    %3 = arith.truncf %2 : vector<48x8xf32> to vector<48x8xbf16>
    %cst = arith.constant dense<0.000000e+00> : vector<64x8xf32>
    %4 = tpu.matmul %1, %3, %cst {dimension_numbers = #tpu.dot_dimension_numbers<[1], [0], [0], [1], [0, 0, 1, 1], [], []>} : vector<64x48xbf16>, vector<48x8xbf16>, vector<64x8xf32> -> vector<64x8xf32>
    %c0_3 = arith.constant 0 : index
    %c0_4 = arith.constant 0 : index
    %5 = vector.load %arg3[%c0_3, %c0_4] : memref<1x8xf32, #tpu.memory_space<vmem>>, vector<1x8xf32>
    %6 = vector.broadcast %5 : vector<1x8xf32> to vector<64x8xf32>
    %7 = arith.addf %4, %6 : vector<64x8xf32>
    %cst_5 = arith.constant dense<0.000000e+00> : vector<64xf32>
    %8 = vector.multi_reduction <add>, %7, %cst_5 [1] : vector<64x8xf32> to vector<64xf32>
    %9 = vector.shape_cast %8 : vector<64xf32> to vector<64x1xf32>
    %cst_6 = arith.constant 8.000000e+00 : f32
    %10 = vector.broadcast %cst_6 : f32 to vector<64x1xf32>
    %11 = arith.divf %9, %10 : vector<64x1xf32>
    %12 = vector.broadcast %11 : vector<64x1xf32> to vector<64x8xf32>
    %13 = arith.subf %7, %12 : vector<64x8xf32>
    %14 = arith.mulf %13, %13 : vector<64x8xf32>
    %cst_7 = arith.constant dense<0.000000e+00> : vector<64xf32>
    %15 = vector.multi_reduction <add>, %14, %cst_7 [1] : vector<64x8xf32> to vector<64xf32>
    %16 = vector.shape_cast %15 : vector<64xf32> to vector<64x1xf32>
    %cst_8 = arith.constant 8.000000e+00 : f32
    %17 = vector.broadcast %cst_8 : f32 to vector<64x1xf32>
    %18 = arith.divf %16, %17 : vector<64x1xf32>
    %19 = vector.broadcast %11 : vector<64x1xf32> to vector<64x8xf32>
    %20 = arith.subf %7, %19 : vector<64x8xf32>
    %cst_9 = arith.constant 9.99999997E-7 : f32
    %21 = vector.broadcast %cst_9 : f32 to vector<64x1xf32>
    %22 = arith.addf %18, %21 : vector<64x1xf32>
    %23 = math.rsqrt %22 : vector<64x1xf32>
    %24 = vector.broadcast %23 : vector<64x1xf32> to vector<64x8xf32>
    %25 = arith.mulf %20, %24 : vector<64x8xf32>
    %c0_10 = arith.constant 0 : index
    %c0_11 = arith.constant 0 : index
    %26 = vector.load %arg4[%c0_10, %c0_11] : memref<1x8xf32, #tpu.memory_space<vmem>>, vector<1x8xf32>
    %27 = vector.broadcast %26 : vector<1x8xf32> to vector<64x8xf32>
    %28 = arith.mulf %25, %27 : vector<64x8xf32>
    %c0_12 = arith.constant 0 : index
    %c0_13 = arith.constant 0 : index
    %29 = vector.load %arg5[%c0_12, %c0_13] : memref<1x8xf32, #tpu.memory_space<vmem>>, vector<1x8xf32>
    %30 = vector.broadcast %29 : vector<1x8xf32> to vector<64x8xf32>
    %31 = arith.addf %28, %30 : vector<64x8xf32>
    %c0_14 = arith.constant 0 : index
    %c0_15 = arith.constant 0 : index
    %32 = vector.load %arg6[%c0_14, %c0_15] : memref<64x8xf32, #tpu.memory_space<vmem>>, vector<64x8xf32>
    tpu.vector_store %arg6[%c0_14, %c0_15], %31 {strides = array<i32>} : memref<64x8xf32, #tpu.memory_space<vmem>>, vector<64x8xf32>,
    return
  }
  func.func @transform_0(%arg0: i32) -> (i32, i32) {
    %c0_i32 = arith.constant 0 : i32
    %c0_i32_0 = arith.constant 0 : i32
    return %arg0, %c0_i32 : i32, i32
  }
  func.func @transform_1(%arg0: i32) -> (i32, i32) {
    %c0_i32 = arith.constant 0 : i32
    %c0_i32_0 = arith.constant 0 : i32
    %c0_i32_1 = arith.constant 0 : i32
    return %c0_i32, %c0_i32_0 : i32, i32
  }
  func.func @transform_2(%arg0: i32) -> (i32, i32) {
    %c0_i32 = arith.constant 0 : i32
    %c0_i32_0 = arith.constant 0 : i32
    %c0_i32_1 = arith.constant 0 : i32
    return %c0_i32, %c0_i32_0 : i32, i32
  }
  func.func @transform_3(%arg0: i32) -> (i32, i32) {
    %c0_i32 = arith.constant 0 : i32
    %c0_i32_0 = arith.constant 0 : i32
    %c0_i32_1 = arith.constant 0 : i32
    return %c0_i32, %c0_i32_0 : i32, i32
  }
  func.func @transform_4(%arg0: i32) -> (i32, i32) {
    %c0_i32 = arith.constant 0 : i32
    %c0_i32_0 = arith.constant 0 : i32
    %c0_i32_1 = arith.constant 0 : i32
    return %c0_i32, %c0_i32_0 : i32, i32
  }
  func.func @transform_5(%arg0: i32) -> (i32, i32) {
    %c0_i32 = arith.constant 0 : i32
    %c0_i32_0 = arith.constant 0 : i32
    return %arg0, %c0_i32 : i32, i32
  }
}

</mosaic_0001>

<bundles_post_ra>
// kernel: tpu_custom_call.1
= control target key start
LH: loop header
LB: loop body
LE: loop exit
PB: predicated region body
PF: predicated region fallthrough
CT: control target
= control target key end

     0   :  { %s642_s18 = smov 0   ;;  %s771_s0 = inlined_call_operand.vmem [shape: f32[128,48], index: 0, kind: input, shape index: {}]   ;;  %s772_s1 = inlined_call_operand.vmem [shape: f32[48,8], index: 1, kind: input, shape index: {}]   ;;  %s773_s2 = inlined_call_operand.vmem [shape: f32[1,8], index: 2, kind: input, shape index: {}]   ;;  %s774_s3 = inlined_call_operand.vmem [shape: f32[1,8], index: 3, kind: input, shape index: {}]   ;;  %s775_s4 = inlined_call_operand.vmem [shape: f32[1,8], index: 4, kind: input, shape index: {}]   ;;  %s776_s5 = inlined_call_operand.vmem [shape: f32[128,8], index: 5, kind: output, shape index: {}]  }
   0x1 LB: > { %s535_s19 = sadd.s32 4294967295, %s610_s18   ;;  %p539_p0 = scmp.ge.s32.totalorder %s610_s18, 1  ;;  %s610_s18 = sphi %s642_s18, %s15_s18  }
   0x2   : > { %p188_p1 = scmp.lt.s32.totalorder %s610_s18, 3 }
   0x4   : > { %p189_p2 = pnand %p539_p0, %p188_p1 }
   0x5   : > { %v241_v0 = vld [vmem:[%s772_s1] sm:$0xff] (!%p189_p2)  ;;  %v242_v1 = vld [vmem:[%s772_s1 + $0x8] sm:$0xff] (!%p189_p2)  ;;  %v243_v2 = vld [vmem:[%s772_s1 + $0x10] sm:$0xff] (!%p189_p2)  ;;  %s540_s26 = sshll.u32 (!%p189_p2), %s535_s19, 3  ;;  %vm257_vm0 = vcmask (!%p189_p2), 392192   ;;  %vm335_vm1 = vcmask (!%p189_p2), 64512  }
   0x6   : > { %192 = sbr.rel (%p189_p2) target bundleno = 565 (0x235), region = 40  ;;  %v247_v3 = vpack.c.bf16 (!%p189_p2), %v242_v1, %v241_v0  ;;  %v244_v4 = vld [vmem:[%s772_s1 + $0x18] sm:$0xff] (!%p189_p2)  ;;  %p217_p3 = scmp.lt.s32.totalorder (!%p189_p2), %s540_s26, 15  ;;  %v245_v6 = vld [vmem:[%s772_s1 + $0x20] sm:$0xff] (!%p189_p2)  ;;  %v246_v7 = vld [vmem:[%s772_s1 + $0x28] sm:$0xff] (!%p189_p2) }
   0x7   : > { %v248_v5 = vpack.c.bf16 (!%p189_p2), %v244_v4, %v243_v2  ;;  %v249_v8 = vpack.c.bf16 (!%p189_p2), %v246_v7, %v245_v6  ;;  %v544_v21 = vld [vmem:[%s773_s2] ss:$0 sm:$0xff] (!%p189_p2) }
   0x8   : > { %560 = vmatprep.subr.bf16.mxu0 (!%p189_p2), %v247_v3  ;;  %574 = vmatprep.subr.bf16.mxu1 (!%p189_p2), %v247_v3 }
   0x9   : > { %561 = vmatpush3.bf16.msra.mxu0 (!%p189_p2), %v247_v3  ;;  %577 = vmatpush3.bf16.msra.mxu1 (!%p189_p2), %v247_v3 }
   0xa   : > { %562 = vmatprep.subr.bf16.mxu0 (!%p189_p2), %v248_v5  ;;  %575 = vmatprep.subr.bf16.mxu1 (!%p189_p2), %v248_v5 }
   0xd   : > { %s778_s26 = smov (!%p217_p3, %s540_s26), 15  ;;  %563 = vmatpush3.bf16.msra.mxu0 %v248_v5  ;;  %578 = vmatpush3.bf16.msra.mxu1 %v248_v5 }
   0xe   : > { %s541_s8 = sshll.u32 %s778_s26, 3  ;;  %564 = vmatprep.subr.bf16.mxu0 %v249_v8  ;;  %576 = vmatprep.subr.bf16.mxu1 %v249_v8 }
   0xf   : > { %s220_s11 = scalar_lea.vmem %s771_s0, %s541_s8  ;;  %s743_s21 = scalar_lea.vmem %s776_s5, %s541_s8 }
  0x10   : > { %v229_v9 = vld [vmem:[%s220_s11] sm:$0xff]  ;;  %v230_v10 = vld [vmem:[%s220_s11 + $0x8] sm:$0xff]  ;;  %v231_v11 = vld [vmem:[%s220_s11 + $0x10] sm:$0xff] }
  0x11   : > { %v237_v12 = vpack.c.bf16 %v230_v10, %v229_v9  ;;  %v232_v13 = vld [vmem:[%s220_s11 + $0x18] sm:$0xff]  ;;  %v233_v14 = vld [vmem:[%s220_s11 + $0x20] sm:$0xff]  ;;  %v234_v15 = vld [vmem:[%s220_s11 + $0x28] sm:$0xff]  ;;  %565 = vmatpush3.bf16.msra.mxu0 %v249_v8  ;;  %579 = vmatpush3.bf16.msra.mxu1 %v249_v8 }
  0x12   : > { %v239_v16 = vpack.c.bf16 %v234_v15, %v233_v14  ;;  %v235_v17 = vld [vmem:[%s220_s11 + $0x30] sm:$0xff]  ;;  %v236_v18 = vld [vmem:[%s220_s11 + $0x38] sm:$0xff]  ;;  %v238_v19 = vpack.c.bf16 %v232_v13, %v231_v11 }
  0x13   : > { %566 = vmatprep.mubr.msk.bf16.mxu0 %vm257_vm0, %v237_v12  ;;  %v240_v20 = vpack.c.bf16 %v236_v18, %v235_v17 }
  0x14   : > { %570 = vmatprep.mubr.msk.bf16.mxu1 %vm257_vm0, %v239_v16  ;;  %567 = vmatmul.mubr.msk.bf16.vlgmr.msra.gmra.mrb[0].mxu0 %vm257_vm0, %v238_v19 }
  0x15   : > { %571 = vmatmul.mubr.msk.bf16.vlgmr.msra.gmra.mrb[0].mxu1 %vm257_vm0, %v240_v20 }
  0xe7   : > { %v568_v22 = vpop.f32.mrb[0].mxu0 }
  0xe8   : > { %v572_v23 = vpop.f32.mrb[0].mxu1  ;;  %v313_v24 = vadd.f32 %v568_v22, %v544_v21  ;;  %v304_v25 = vpop.f32.mrb[1].mxu0 }
  0xe9   : > { %v320_v26 = vpop.f32.mrb[1].mxu1  ;;  %v305_v27 = vadd.f32 %v544_v21, %v304_v25  ;;  %v569_v28 = vpop.f32.mrb[2].mxu0  ;;  %v329_v42 = vadd.f32 %v572_v23, %v544_v21 }
  0xea   : > { %v321_v29 = vadd.f32 %v544_v21, %v320_v26  ;;  %v573_v30 = vpop.f32.mrb[2].mxu1  ;;  %v316_v31 = vadd.f32 %v569_v28, %v544_v21  ;;  %v307_v32 = vpop.f32.mrb[3].mxu0  ;;  %v342_v34 = vsel %vm335_vm1, %v313_v24, 0.0 }
  0xeb   : > { %v323_v33 = vpop.f32.mrb[3].mxu1  ;;  %343 = vadd.xlane.f32.xlu1 %v342_v34  ;;  %v336_v35 = vsel %vm335_vm1, %v305_v27, 0.0  ;;  %v308_v39 = vadd.f32 %v544_v21, %v307_v32  ;;  %v332_v40 = vadd.f32 %v573_v30, %v544_v21  ;;  %v354_v45 = vsel %vm335_vm1, %v329_v42, 0.0 }
  0xec   : > { %337 = vadd.xlane.f32.xlu0 %v336_v35  ;;  %v348_v36 = vsel %vm335_vm1, %v321_v29, 0.0  ;;  %v324_v37 = vadd.f32 %v544_v21, %v323_v33  ;;  %v345_v38 = vsel %vm335_vm1, %v316_v31, 0.0 }
  0xed   : > { %v339_v43 = vsel %vm335_vm1, %v308_v39, 0.0  ;;  %v357_v44 = vsel %vm335_vm1, %v332_v40, 0.0 }
  0xee   : > { %v351_v41 = vsel %vm335_vm1, %v324_v37, 0.0 }
  0xef   : > { %346 = vadd.xlane.f32.xlu1 %v345_v38 }
  0xf0   : > { %349 = vadd.xlane.f32.xlu0 %v348_v36 }
  0xf3   : > { %352 = vadd.xlane.f32.xlu1 %v351_v41 }
  0xf4   : > { %340 = vadd.xlane.f32.xlu0 %v339_v43 }
  0xf7   : > { %358 = vadd.xlane.f32.xlu1 %v357_v44 }
  0xf8   : > { %355 = vadd.xlane.f32.xlu0 %v354_v45 }
 0x178   : > { %v344_v46 = vpop.xlane.xlu1 %343 }
 0x179   : > { %v363_v47 = vmul.f32 0.125, %v344_v46  ;;  %v338_v48 = vpop.xlane.xlu0 %337  ;;  %v550_v46 = vld [vmem:[%s775_s4] ss:$0 sm:$0xff] }
 0x17a   : > { %v361_v49 = vmul.f32 0.125, %v338_v48 }
 0x17b   : > { %v691_v50 = vsub.f32 %v313_v24, %v363_v47 }
 0x17c   : > { %v693_v51 = vsub.f32 %v305_v27, %v361_v49  ;;  %v347_v52 = vpop.xlane.xlu1 %346 }
 0x17d   : > { %v364_v53 = vmul.f32 0.125, %v347_v52  ;;  %v350_v54 = vpop.xlane.xlu0 %349  ;;  %v379_v55 = vmul.f32 %v691_v50, %v691_v50 }
 0x17e   : > { %v365_v56 = vmul.f32 0.125, %v350_v54  ;;  %v377_v59 = vmul.f32 %v693_v51, %v693_v51 }
 0x17f   : > { %v697_v57 = vsub.f32 %v316_v31, %v364_v53  ;;  %v391_v58 = vsel %vm335_vm1, %v379_v55, 0.0 }
 0x180   : > { %v702_v60 = vsub.f32 %v321_v29, %v365_v56  ;;  %v353_v61 = vpop.xlane.xlu1 %352  ;;  %392 = vadd.xlane.f32.xlu0 %v391_v58  ;;  %v385_v3 = vsel %vm335_vm1, %v377_v59, 0.0 }
 0x181   : > { %v366_v62 = vmul.f32 0.125, %v353_v61  ;;  %v341_v63 = vpop.xlane.xlu0 %340  ;;  %v380_v0 = vmul.f32 %v697_v57, %v697_v57 }
 0x182   : > { %v362_v1 = vmul.f32 0.125, %v341_v63  ;;  %v381_v4 = vmul.f32 %v702_v60, %v702_v60 }
 0x183   : > { %v394_v2 = vsel %vm335_vm1, %v380_v0, 0.0  ;;  %v710_v5 = vsub.f32 %v324_v37, %v366_v62 }
 0x184   : > { %v712_v6 = vsub.f32 %v308_v39, %v362_v1  ;;  %395 = vadd.xlane.f32.xlu1 %v394_v2  ;;  %v359_v7 = vpop.xlane.xlu1 %358  ;;  %386 = vadd.xlane.f32.xlu0 %v385_v3  ;;  %v397_v12 = vsel %vm335_vm1, %v381_v4, 0.0 }
 0x185   : > { %v368_v8 = vmul.f32 0.125, %v359_v7  ;;  %v356_v9 = vpop.xlane.xlu0 %355  ;;  %v382_v16 = vmul.f32 %v710_v5, %v710_v5 }
 0x186   : > { %v367_v10 = vmul.f32 0.125, %v356_v9  ;;  %v378_v11 = vmul.f32 %v712_v6, %v712_v6 }
 0x187   : > { %v717_v13 = vsub.f32 %v332_v40, %v368_v8  ;;  %v400_v18 = vsel %vm335_vm1, %v382_v16, 0.0 }
 0x188   : > { %v719_v14 = vsub.f32 %v329_v42, %v367_v10  ;;  %398 = vadd.xlane.f32.xlu0 %v397_v12  ;;  %v388_v15 = vsel %vm335_vm1, %v378_v11, 0.0  ;;  %v549_v42 = vld [vmem:[%s774_s3] ss:$0 sm:$0xff] }
 0x189   : > { %389 = vadd.xlane.f32.xlu1 %v388_v15  ;;  %v384_v20 = vmul.f32 %v717_v13, %v717_v13 }
 0x18a   : > { %v383_v17 = vmul.f32 %v719_v14, %v719_v14 }
 0x18b   : > { %v406_v21 = vsel %vm335_vm1, %v384_v20, 0.0 }
 0x18c   : > { %v403_v19 = vsel %vm335_vm1, %v383_v17, 0.0 }
 0x18d   : > { %401 = vadd.xlane.f32.xlu1 %v400_v18  ;;  %404 = vadd.xlane.f32.xlu0 %v403_v19 }
 0x191   : > { %407 = vadd.xlane.f32.xlu1 %v406_v21 }
 0x20d   : > { %v393_v22 = vpop.xlane.xlu0 %392 }
 0x20e   : > { %v411_v23 = vmul.f32 0.125, %v393_v22 }
 0x210   : > { %v419_v24 = vadd.f32 1e-06, %v411_v23 }
 0x211   : > { %v396_v25 = vpop.xlane.xlu1 %395  ;;  %v387_v26 = vpop.xlane.xlu0 %386 }
 0x212   : > { %588 = vrsqrt.f32 %v419_v24  ;;  %v412_v27 = vmul.f32 0.125, %v396_v25  ;;  %v409_v28 = vmul.f32 0.125, %v387_v26 }
 0x214   : > { %v420_v29 = vadd.f32 1e-06, %v412_v27  ;;  %v417_v30 = vadd.f32 1e-06, %v409_v28 }
 0x215   : > { %v399_v31 = vpop.xlane.xlu0 %398 }
 0x216   : > { %590 = vrsqrt.f32 %v420_v29  ;;  %v413_v32 = vmul.f32 0.125, %v399_v31  ;;  %v390_v33 = vpop.xlane.xlu1 %389 }
 0x217   : > { %592 = vrsqrt.f32 %v417_v30  ;;  %v410_v34 = vmul.f32 0.125, %v390_v33 }
 0x218   : > { %v421_v35 = vadd.f32 1e-06, %v413_v32 }
 0x219   : > { %v418_v36 = vadd.f32 1e-06, %v410_v34 }
 0x21a   : > { %594 = vrsqrt.f32 %v421_v35  ;;  %v402_v37 = vpop.xlane.xlu1 %401  ;;  %v405_v38 = vpop.xlane.xlu0 %404 }
 0x21b   : > { %596 = vrsqrt.f32 %v418_v36  ;;  %v414_v39 = vmul.f32 0.125, %v402_v37  ;;  %v415_v40 = vmul.f32 0.125, %v405_v38 }
 0x21c   : > { %v589_v41 = vpop.eup %588 }
 0x21d   : > { %v435_v43 = vmul.f32 %v589_v41, %v691_v50  ;;  %v422_v44 = vadd.f32 1e-06, %v414_v39  ;;  %v423_v45 = vadd.f32 1e-06, %v415_v40 }
 0x21e   : > { %v408_v47 = vpop.xlane.xlu1 %407 }
 0x21f   : > { %v450_v48 = vmul.f32 %v549_v42, %v435_v43  ;;  %598 = vrsqrt.f32 %v422_v44  ;;  %v416_v49 = vmul.f32 0.125, %v408_v47 }
 0x220   : > { %v591_v52 = vpop.eup %590  ;;  %600 = vrsqrt.f32 %v423_v45 }
 0x221   : > { %v593_v50 = vpop.eup %592  ;;  %v465_v53 = vadd.f32 %v550_v46, %v450_v48  ;;  %v436_v54 = vmul.f32 %v591_v52, %v697_v57  ;;  %v424_v55 = vadd.f32 1e-06, %v416_v49 }
 0x222   : > { %v433_v56 = vmul.f32 %v593_v50, %v693_v51 }
 0x223   : > { %473 = vst.msk [vmem:[%s743_s21 + $0x10] sm:$0xff] %vm335_vm1, %v465_v53  ;;  %v451_v58 = vmul.f32 %v549_v42, %v436_v54  ;;  %602 = vrsqrt.f32 %v424_v55 }
 0x224   : > { %v595_v59 = vpop.eup %594  ;;  %v448_v61 = vmul.f32 %v549_v42, %v433_v56 }
 0x225   : > { %v597_v62 = vpop.eup %596  ;;  %v466_v63 = vadd.f32 %v550_v46, %v451_v58  ;;  %v437_v0 = vmul.f32 %v595_v59, %v702_v60 }
 0x226   : > { %v463_v1 = vadd.f32 %v550_v46, %v448_v61  ;;  %v434_v2 = vmul.f32 %v597_v62, %v712_v6 }
 0x227   : > { %474 = vst.msk [vmem:[%s743_s21 + $0x18] sm:$0xff] %vm335_vm1, %v466_v63  ;;  %v452_v57 = vmul.f32 %v549_v42, %v437_v0 }
 0x228   : > { %471 = vst.msk [vmem:[%s743_s21] sm:$0xff] %vm335_vm1, %v463_v1  ;;  %v449_v51 = vmul.f32 %v549_v42, %v434_v2 }
 0x229   : > { %v599_v3 = vpop.eup %598  ;;  %v467_v4 = vadd.f32 %v550_v46, %v452_v57 }
 0x22a   : > { %v601_v7 = vpop.eup %600  ;;  %v464_v8 = vadd.f32 %v550_v46, %v449_v51  ;;  %v438_v9 = vmul.f32 %v599_v3, %v710_v5 }
 0x22b   : > { %475 = vst.msk [vmem:[%s743_s21 + $0x20] sm:$0xff] %vm335_vm1, %v467_v4  ;;  %v439_v60 = vmul.f32 %v601_v7, %v719_v14 }
 0x22c   : > { %472 = vst.msk [vmem:[%s743_s21 + $0x8] sm:$0xff] %vm335_vm1, %v464_v8  ;;  %v453_v6 = vmul.f32 %v549_v42, %v438_v9 }
 0x22d   : > { %v603_v10 = vpop.eup %602  ;;  %v454_v11 = vmul.f32 %v549_v42, %v439_v60 }
 0x22e   : > { %v468_v12 = vadd.f32 %v550_v46, %v453_v6  ;;  %v440_v15 = vmul.f32 %v603_v10, %v717_v13 }
 0x22f   : > { %v469_v16 = vadd.f32 %v550_v46, %v454_v11 }
 0x230   : > { %476 = vst.msk [vmem:[%s743_s21 + $0x28] sm:$0xff] %vm335_vm1, %v468_v12  ;;  %v455_v17 = vmul.f32 %v549_v42, %v440_v15 }
 0x231   : > { %477 = vst.msk [vmem:[%s743_s21 + $0x30] sm:$0xff] %vm335_vm1, %v469_v16 }
 0x232   : > { %v470_v18 = vadd.f32 %v550_v46, %v455_v17 }
 0x234   : > { %478 = vst.msk [vmem:[%s743_s21 + $0x38] sm:$0xff] %vm335_vm1, %v470_v18 }
 0x235 PF: > { %s15_s18 = sadd.s32 1, %s610_s18  }
 0x236   : > { %p12_p4 = scmp.ge.s32.totalorder %s15_s18, 4  }
 0x238   :  { %14 = sbr.rel (!%p12_p4) target bundleno = 1 (0x1), region = 70 }

</bundles_post_ra>
